<compile_context>
chip_gen: v7x
topology: tpu7x:2x2x1
jax: 0.10.0
libtpu: 0.0.40
codegen_flags: <defaults>
</compile_context>

<pallas_src>
import math
from functools import partial

import jax
import jax.numpy as jnp
from jax.experimental import pallas as pl
from jax.experimental.pallas import tpu as pltpu


# ----------------------------------------------------------------------------
# helpers
# ----------------------------------------------------------------------------
def _round_up(x, m):
    return ((x + m - 1) // m) * m


def _row_tile(m, bytes_per_row, target=1 << 20):
    """Row tile targeting ~1 MiB blocks for elementwise / reduction kernels."""
    r = max(8, (target // max(bytes_per_row, 1)) // 8 * 8)
    if r >= m:
        return int(m)          # single block == full dim (always a legal block)
    return int(r)              # multiple of 8; last block may be partial


def _mm_tiles(M, K, N):
    tm = 256 if M >= 256 else M           # full-M block when small (legal), 256 else
    if N >= 512:
        tn = 256
    elif N >= 128:
        tn = 128                           # keeps >=2 parallel N blocks for N=256
    else:
        tn = N                             # narrow outputs: full-N block
    Kp = _round_up(K, 128)
    tk = 128
    d = 256
    while d <= min(Kp, 2048):              # largest 128-multiple divisor of Kp
        if Kp % d == 0:
            tk = d
        d += 128
    return tm, tn, tk, Kp


# ----------------------------------------------------------------------------
# Pallas kernels
# ----------------------------------------------------------------------------
def _mm_acc_kernel(a_ref, b_ref, o_ref):
    """Matmul, no epilogue: accumulate straight into the resident output block."""
    @pl.when(pl.program_id(2) == 0)
    def _():
        o_ref[...] = jnp.zeros_like(o_ref)

    o_ref[...] += jnp.dot(a_ref[...], b_ref[...],
                          preferred_element_type=jnp.float32)


def _mm_ep_kernel(a_ref, b_ref, bias_ref, o_ref, acc_ref, *, relu):
    """Matmul with fused bias (+ optional ReLU) epilogue."""
    @pl.when(pl.program_id(2) == 0)
    def _():
        acc_ref[...] = jnp.zeros_like(acc_ref)

    acc_ref[...] += jnp.dot(a_ref[...], b_ref[...],
                            preferred_element_type=jnp.float32)

    @pl.when(pl.program_id(2) == pl.num_programs(2) - 1)
    def _():
        r = acc_ref[...] + bias_ref[...]
        if relu:
            r = jnp.maximum(r, 0.0)
        o_ref[...] = r.astype(o_ref.dtype)


def pallas_matmul(a, b, bias=None, relu=False):
    """(M, K) @ (K, N) -> (M, N) f32.  bf16 operands, f32 MXU accumulation,
    optional fused bias/ReLU.  Only K is zero-padded; M/N edge blocks masked."""
    M, K = a.shape
    K2, N = b.shape
    assert K == K2
    tm, tn, tk, Kp = _mm_tiles(M, K, N)
    a_p = a.astype(jnp.bfloat16)
    b_p = b.astype(jnp.bfloat16)
    if Kp != K:
        a_p = jnp.pad(a_p, ((0, 0), (0, Kp - K)))
        b_p = jnp.pad(b_p, ((0, Kp - K), (0, 0)))
    grid = (pl.cdiv(M, tm), pl.cdiv(N, tn), Kp // tk)
    dimsem = ("parallel", "parallel", "arbitrary")

    if bias is None and not relu:
        return pl.pallas_call(
            _mm_acc_kernel,
            out_shape=jax.ShapeDtypeStruct((M, N), jnp.float32),
            grid_spec=pltpu.PrefetchScalarGridSpec(
                num_scalar_prefetch=0, grid=grid,
                in_specs=[pl.BlockSpec((tm, tk), lambda i, j, k: (i, k)),
                          pl.BlockSpec((tk, tn), lambda i, j, k: (k, j))],
                out_specs=pl.BlockSpec((tm, tn), lambda i, j, k: (i, j))),
            compiler_params=pltpu.CompilerParams(dimension_semantics=dimsem),
        )(a_p, b_p)

    bias_arr = (jnp.zeros((1, N), jnp.float32) if bias is None
                else bias.reshape(1, N).astype(jnp.float32))
    return pl.pallas_call(
        partial(_mm_ep_kernel, relu=relu),
        out_shape=jax.ShapeDtypeStruct((M, N), jnp.float32),
        grid_spec=pltpu.PrefetchScalarGridSpec(
            num_scalar_prefetch=0, grid=grid,
            in_specs=[pl.BlockSpec((tm, tk), lambda i, j, k: (i, k)),
                      pl.BlockSpec((tk, tn), lambda i, j, k: (k, j)),
                      pl.BlockSpec((1, tn), lambda i, j, k: (0, j))],
            out_specs=pl.BlockSpec((tm, tn), lambda i, j, k: (i, j)),
            scratch_shapes=[pltpu.VMEM((tm, tn), jnp.float32)]),
        compiler_params=pltpu.CompilerParams(dimension_semantics=dimsem),
    )(a_p, b_p, bias_arr)


def _bn_stats_kernel(x_ref, s_ref, q_ref, *, m_total):
    i = pl.program_id(0)

    @pl.when(i == 0)
    def _():
        s_ref[...] = jnp.zeros_like(s_ref)
        q_ref[...] = jnp.zeros_like(q_ref)

    x = x_ref[...]
    ridx = jax.lax.broadcasted_iota(jnp.int32, x.shape, 0) + i * x.shape[0]
    x = jnp.where(ridx < m_total, x, 0.0)
    s_ref[...] += jnp.sum(x, axis=0, keepdims=True)
    q_ref[...] += jnp.sum(x * x, axis=0, keepdims=True)


def _bn_apply_kernel(x_ref, s_ref, q_ref, g_ref, b_ref, o_ref,
                     *, m_total, eps, relu):
    inv_m = 1.0 / m_total
    mean = s_ref[...] * inv_m
    var = jnp.maximum(q_ref[...] * inv_m - mean * mean, 0.0)
    scale = g_ref[...] * jax.lax.rsqrt(var + eps)
    shift = b_ref[...] - mean * scale
    y = x_ref[...] * scale + shift
    if relu:
        y = jnp.maximum(y, 0.0)
    o_ref[...] = y


def _bn_add_relu_kernel(x_ref, r_ref, s_ref, q_ref, g_ref, b_ref, o_ref,
                        *, m_total, eps, relu):
    inv_m = 1.0 / m_total
    mean = s_ref[...] * inv_m
    var = jnp.maximum(q_ref[...] * inv_m - mean * mean, 0.0)
    scale = g_ref[...] * jax.lax.rsqrt(var + eps)
    shift = b_ref[...] - mean * scale
    y = x_ref[...] * scale + shift + r_ref[...]
    if relu:
        y = jnp.maximum(y, 0.0)
    o_ref[...] = y


@partial(jax.jit, static_argnames=("relu",))
def _pallas_bn(x2, gamma, beta, res2, relu):
    """Training-mode BatchNorm over (M, C), two-pass tiled, fused ReLU and
    (optionally) fused residual add."""
    M, C = x2.shape
    rows = _row_tile(M, 4 * C)
    grid = (pl.cdiv(M, rows),)
    x_spec = pl.BlockSpec((rows, C), lambda i: (i, 0))
    vec_spec = pl.BlockSpec((1, C), lambda i: (0, 0))

    ssum, ssq = pl.pallas_call(
        partial(_bn_stats_kernel, m_total=M),
        out_shape=(jax.ShapeDtypeStruct((1, C), jnp.float32),
                   jax.ShapeDtypeStruct((1, C), jnp.float32)),
        grid_spec=pltpu.PrefetchScalarGridSpec(
            num_scalar_prefetch=0, grid=grid,
            in_specs=[x_spec],
            out_specs=[vec_spec, vec_spec]),
        compiler_params=pltpu.CompilerParams(
            dimension_semantics=("arbitrary",)),
    )(x2)

    g = gamma.reshape(1, C)
    b = beta.reshape(1, C)
    if res2 is None:
        kern = partial(_bn_apply_kernel, m_total=M, eps=1e-5, relu=relu)
        ins = (x2, ssum, ssq, g, b)
        in_specs = [x_spec, vec_spec, vec_spec, vec_spec, vec_spec]
    else:
        kern = partial(_bn_add_relu_kernel, m_total=M, eps=1e-5, relu=relu)
        ins = (x2, res2, ssum, ssq, g, b)
        in_specs = [x_spec, x_spec, vec_spec, vec_spec, vec_spec, vec_spec]
    return pl.pallas_call(
        kern,
        out_shape=jax.ShapeDtypeStruct((M, C), jnp.float32),
        grid_spec=pltpu.PrefetchScalarGridSpec(
            num_scalar_prefetch=0, grid=grid,
            in_specs=in_specs,
            out_specs=x_spec),
        compiler_params=pltpu.CompilerParams(
            dimension_semantics=("parallel",)),
    )(*ins)


def _pool_kernel(p_ref, o_ref, *, op):
    p = p_ref[...]
    if op == "max":
        o_ref[...] = jnp.max(p, axis=1)
    else:
        o_ref[...] = jnp.mean(p, axis=1)


@partial(jax.jit, static_argnames=("op",))
def pallas_pool(p3, op):
    M, KK, C = p3.shape
    rows = _row_tile(M, 4 * KK * C)
    grid = (pl.cdiv(M, rows),)
    return pl.pallas_call(
        partial(_pool_kernel, op=op),
        out_shape=jax.ShapeDtypeStruct((M, C), jnp.float32),
        grid_spec=pltpu.PrefetchScalarGridSpec(
            num_scalar_prefetch=0, grid=grid,
            in_specs=[pl.BlockSpec((rows, KK, C), lambda i: (i, 0, 0))],
            out_specs=pl.BlockSpec((rows, C), lambda i: (i, 0))),
        compiler_params=pltpu.CompilerParams(
            dimension_semantics=("parallel",)),
    )(p3)


def _splat_gap_kernel(x_ref, o_ref, *, c, hw):
    i = pl.program_id(0)

    @pl.when(i == 0)
    def _():
        o_ref[...] = jnp.zeros_like(o_ref)

    x = x_ref[...]
    ridx = jax.lax.broadcasted_iota(jnp.int32, x.shape, 1) + i * x.shape[1]
    x = jnp.where(ridx < hw, x, 0.0)
    o_ref[...] += jnp.sum(x[:, :, :c] + x[:, :, c:], axis=1) * (1.0 / hw)


@partial(jax.jit, static_argnames=("c",))
def pallas_splat_gap(x3, c):
    B, HW, C2 = x3.shape
    rows = _row_tile(HW, 4 * B * C2)
    grid = (pl.cdiv(HW, rows),)
    return pl.pallas_call(
        partial(_splat_gap_kernel, c=c, hw=HW),
        out_shape=jax.ShapeDtypeStruct((B, c), jnp.float32),
        grid_spec=pltpu.PrefetchScalarGridSpec(
            num_scalar_prefetch=0, grid=grid,
            in_specs=[pl.BlockSpec((B, rows, C2), lambda i: (0, i, 0))],
            out_specs=pl.BlockSpec((B, c), lambda i: (0, 0))),
        compiler_params=pltpu.CompilerParams(
            dimension_semantics=("arbitrary",)),
    )(x3)


def _splat_combine_kernel(x_ref, a_ref, o_ref, *, c):
    # rSoftMax over radix=2 (cardinality=1) + attention-weighted combine.
    x = x_ref[...]
    a = a_ref[...]
    l0, l1 = a[:, :, :c], a[:, :, c:]
    m = jnp.maximum(l0, l1)
    e0 = jnp.exp(l0 - m)
    e1 = jnp.exp(l1 - m)
    inv = 1.0 / (e0 + e1)
    o_ref[...] = x[:, :, :c] * (e0 * inv) + x[:, :, c:] * (e1 * inv)


@partial(jax.jit, static_argnames=("c",))
def pallas_splat_combine(x3, att, c):
    B, HW, C2 = x3.shape
    rows = _row_tile(HW, 4 * B * C2)
    grid = (pl.cdiv(HW, rows),)
    return pl.pallas_call(
        partial(_splat_combine_kernel, c=c),
        out_shape=jax.ShapeDtypeStruct((B, HW, c), jnp.float32),
        grid_spec=pltpu.PrefetchScalarGridSpec(
            num_scalar_prefetch=0, grid=grid,
            in_specs=[pl.BlockSpec((B, rows, C2), lambda i: (0, i, 0)),
                      pl.BlockSpec((B, 1, C2), lambda i: (0, 0, 0))],
            out_specs=pl.BlockSpec((B, rows, c), lambda i: (0, i, 0))),
        compiler_params=pltpu.CompilerParams(
            dimension_semantics=("parallel",)),
    )(x3, att)


# ----------------------------------------------------------------------------
# Conv / pooling wrappers (im2col glue + Pallas matmul / reductions)
# ----------------------------------------------------------------------------
def _im2col(x, kh, kw, stride, padding, dilation, pad_value):
    """x: (B, H, W, C) -> patches (B, Ho, Wo, kh*kw*C), tap-major channel order."""
    B, H, W, C = x.shape
    x_p = jnp.pad(x, ((0, 0), (padding, padding), (padding, padding), (0, 0)),
                  constant_values=pad_value)
    Ho = (H + 2 * padding - dilation * (kh - 1) - 1) // stride + 1
    Wo = (W + 2 * padding - dilation * (kw - 1) - 1) // stride + 1
    cols = []
    for iy in range(kh):
        for ix in range(kw):
            y0, x0 = iy * dilation, ix * dilation
            patch = jax.lax.slice(
                x_p, (0, y0, x0, 0),
                (B, y0 + (Ho - 1) * stride + 1, x0 + (Wo - 1) * stride + 1, C),
                (1, stride, stride, 1))
            cols.append(patch)
    return jnp.concatenate(cols, axis=-1), Ho, Wo


@partial(jax.jit, static_argnames=("stride", "padding", "dilation", "groups", "relu"))
def conv2d(x, w, b=None, *, stride=1, padding=0, dilation=1, groups=1, relu=False):
    """x NHWC, w in torch layout (Cout, Cin/groups, kh, kw), optional bias.
    bf16 operands, bias/ReLU fused in the matmul epilogue."""
    B, H, W, C = x.shape
    Cout, Cin_g, kh, kw = w.shape
    xb = x.astype(jnp.bfloat16)
    wb = w.astype(jnp.bfloat16)
    patches, Ho, Wo = _im2col(xb, kh, kw, stride, padding, dilation, 0.0)
    M = B * Ho * Wo
    Cout_g = Cout // groups
    if groups == 1:
        a = patches.reshape(M, kh * kw * C)
        wf = jnp.transpose(wb, (2, 3, 1, 0)).reshape(kh * kw * C, Cout)
        out = pallas_matmul(a, wf, b, relu=relu)
    else:
        pr = patches.reshape(M, kh * kw, C)
        outs = []
        for g in range(groups):
            pg = pr[:, :, g * Cin_g:(g + 1) * Cin_g].reshape(M, kh * kw * Cin_g)
            wg = jnp.transpose(wb[g * Cout_g:(g + 1) * Cout_g],
                               (2, 3, 1, 0)).reshape(kh * kw * Cin_g, Cout_g)
            bg = None if b is None else b[g * Cout_g:(g + 1) * Cout_g]
            outs.append(pallas_matmul(pg, wg, bg, relu=relu))
        out = jnp.concatenate(outs, axis=1)
    return out.reshape(B, Ho, Wo, Cout)


@partial(jax.jit, static_argnames=("k", "stride", "padding", "op"))
def pool2d(x, *, k, stride, padding, op):
    B, H, W, C = x.shape
    pad_value = float("-inf") if op == "max" else 0.0
    patches, Ho, Wo = _im2col(x, k, k, stride, padding, 1, pad_value)
    p3 = patches.reshape(B * Ho * Wo, k * k, C)
    return pallas_pool(p3, op).reshape(B, Ho, Wo, C)


def batchnorm(x, bn, relu=False, residual=None):
    """Training-mode BatchNorm (batch stats) + optional fused residual add + ReLU."""
    B, H, W, C = x.shape
    M = B * H * W
    x2 = x.reshape(M, C)
    r2 = None if residual is None else residual.reshape(M, C)
    return _pallas_bn(x2, bn["g"], bn["b"], r2, relu=relu).reshape(B, H, W, C)


@partial(jax.jit, static_argnames=("stride", "padding"))
def conv_transpose2d(x, w_t, *, stride=2, padding=1):
    """torch ConvTranspose2d(k=4, stride=2, padding=1, bias=False), weight layout
    (Cin, Cout, k, k), via sub-pixel decomposition into 4 stride-1 2x2 convs."""
    B, H, W, C = x.shape
    Cin, Cout, k, _ = w_t.shape
    assert k == 4 and stride == 2 and padding == 1
    xp = jnp.pad(x, ((0, 0), (1, 1), (1, 1), (0, 0)))
    taps = ((3, 1), (2, 0))  # output phase a (resp. b) uses kernel taps taps[a]
    rows = []
    for a in range(2):
        cols = []
        for bb in range(2):
            wk = w_t[:, :, jnp.array(taps[a]), :][:, :, :, jnp.array(taps[bb])]
            wk = jnp.transpose(wk, (1, 0, 2, 3))          # (Cout, Cin, 2, 2)
            xin = xp[:, a:a + H + 1, bb:bb + W + 1, :]
            cols.append(conv2d(xin, wk, None, stride=1, padding=0))
        rows.append(jnp.stack(cols, axis=3))              # (B, H, W, 2, Cout)
    y = jnp.stack(rows, axis=2)                           # (B, H, 2, W, 2, Cout)
    return y.reshape(B, 2 * H, 2 * W, Cout)


@jax.jit
def _deform_conv(x, offset, mask_logits, w, b):
    """Modulated deformable conv (3x3, stride 1, pad 1, 1 deformable group)."""
    B, H, W, C = x.shape
    Cout = w.shape[0]
    T = 9
    ky = (jnp.arange(T, dtype=jnp.float32) // 3) - 1.0
    kx = (jnp.arange(T, dtype=jnp.float32) % 3) - 1.0
    dy = offset[..., 0::2]
    dx = offset[..., 1::2]
    py = jnp.arange(H, dtype=jnp.float32).reshape(1, H, 1, 1) + ky.reshape(1, 1, 1, T) + dy
    px = jnp.arange(W, dtype=jnp.float32).reshape(1, 1, W, 1) + kx.reshape(1, 1, 1, T) + dx
    y0 = jnp.floor(py)
    x0 = jnp.floor(px)
    ly = py - y0
    lx = px - x0

    def gather(yi, xi):
        valid = (yi >= 0) & (yi <= H - 1) & (xi >= 0) & (xi <= W - 1)
        yc = jnp.clip(yi, 0, H - 1).astype(jnp.int32)
        xc = jnp.clip(xi, 0, W - 1).astype(jnp.int32)
        bidx = jnp.arange(B).reshape(B, 1, 1, 1)
        v = x[bidx, yc, xc, :]
        return v * valid[..., None].astype(x.dtype)

    patches = (gather(y0, x0) * ((1 - ly) * (1 - lx))[..., None]
               + gather(y0, x0 + 1) * ((1 - ly) * lx)[..., None]
               + gather(y0 + 1, x0) * (ly * (1 - lx))[..., None]
               + gather(y0 + 1, x0 + 1) * (ly * lx)[..., None])
    patches = patches * jax.nn.sigmoid(mask_logits)[..., None]
    M = B * H * W
    a = patches.reshape(M, T * C)
    wf = jnp.transpose(w, (2, 3, 1, 0)).reshape(T * C, Cout)
    return pallas_matmul(a, wf, b).reshape(B, H, W, Cout)


def dcn_forward(x, dp):
    om = conv2d(x, dp["offset_w"], dp["offset_b"], stride=1, padding=1)
    # DCNv2: chunk into (o1, o2, mask); offset = cat(o1, o2); mask = sigmoid(mask)
    # TODO(synk): the exact DCNv2 per-tap (dy, dx) offset channel interleaving is
    # assumed; conv_offset_mask is zero-initialized so offsets/mask are 0 / 0.5
    # and the result does not depend on this ordering.
    offset = jnp.concatenate([om[..., 0:9], om[..., 9:18]], axis=-1)
    mask_logits = om[..., 18:27]
    return _deform_conv(x, offset, mask_logits, dp["w"], dp["b"])


# ----------------------------------------------------------------------------
# Network forward (ResNeSt-101 backbone + deconv neck + heads)
# ----------------------------------------------------------------------------
def splat_conv(x, sp, stride):
    # SplAtConv2d(gw, gw, 3, stride, pad=1, groups=1, radix=2, bias=False)
    x = conv2d(x, sp["conv_w"], None, stride=stride, padding=1, groups=2)
    x = batchnorm(x, sp["bn0"], relu=True)
    B, H, W, C2 = x.shape
    C = C2 // 2
    x3 = x.reshape(B, H * W, C2)
    gap = pallas_splat_gap(x3, C).reshape(B, 1, 1, C)
    gap = conv2d(gap, sp["fc1_w"], sp["fc1_b"], stride=1, padding=0)
    gap = batchnorm(gap, sp["bn1"], relu=True)
    att = conv2d(gap, sp["fc2_w"], sp["fc2_b"], stride=1, padding=0)
    out3 = pallas_splat_combine(x3, att.reshape(B, 1, C2), C)
    return out3.reshape(B, H, W, C)


def bottleneck(x, bp):
    stride, avd = bp["stride"], bp["avd"]
    out = conv2d(x, bp["conv1_w"], None, stride=1, padding=0)
    out = batchnorm(out, bp["bn1"], relu=True)
    out = splat_conv(out, bp["splat"], stride=1 if avd else stride)
    if avd:  # avd_first=False: AvgPool2d(3, stride, padding=1) after conv2
        out = pool2d(out, k=3, stride=stride, padding=1, op="avg")
    out = conv2d(out, bp["conv3_w"], None, stride=1, padding=0)
    if "down" in bp:
        d = bp["down"]
        r = x
        if d["pool_k"] > 1:  # avg_down: AvgPool2d(stride, stride, ceil)
            r = pool2d(r, k=d["pool_k"], stride=d["pool_k"], padding=0, op="avg")
        r = conv2d(r, d["conv_w"], None, stride=1, padding=0)
        r = batchnorm(r, d["bn"], relu=False)
    else:
        r = x
    # bn3 + residual add + ReLU fused in a single tiled kernel pass
    return batchnorm(out, bp["bn3"], relu=True, residual=r)


def resnest_forward(x, rp):
    st = rp["stem"]
    x = conv2d(x, st[0]["w"], None, stride=2, padding=1)
    x = batchnorm(x, st[0]["bn"], relu=True)
    x = conv2d(x, st[1]["w"], None, stride=1, padding=1)
    x = batchnorm(x, st[1]["bn"], relu=True)
    x = conv2d(x, st[2]["w"], None, stride=1, padding=1)
    x = batchnorm(x, rp["bn1"], relu=True)
    x = pool2d(x, k=3, stride=2, padding=1, op="max")
    for layer in rp["layers"]:
        for bp in layer:
            x = bottleneck(x, bp)
    return x


def pose_resnest_forward(x_nchw, params):
    x = jnp.transpose(x_nchw, (0, 2, 3, 1)).astype(jnp.float32)  # NCHW -> NHWC
    x = resnest_forward(x, params["resnest"])
    for dp in params["deconv"]:
        x = dcn_forward(x, dp["dcn"])
        x = batchnorm(x, dp["bn1"], relu=True)
        x = conv_transpose2d(x, dp["up_w"], stride=2, padding=1)
        x = batchnorm(x, dp["bn2"], relu=True)

    # -------- heads: pack 3x3 convs into one lane-dense conv and all 1x1 convs
    # into a single block-diagonal matmul, then split the channels per head.
    hp = params["heads"]
    names = list(hp.keys())
    hc = hp[names[0]]["w1"].shape[0]
    classes = [hp[h]["w2"].shape[0] for h in names]
    w1_all = jnp.concatenate([hp[h]["w1"] for h in names], axis=0)
    b1_all = jnp.concatenate([hp[h]["b1"] for h in names], axis=0)
    y = conv2d(x, w1_all, b1_all, stride=1, padding=1, relu=True)

    total_hc = hc * len(names)
    total_cls = sum(classes)
    w2_all = jnp.zeros((total_cls, total_hc, 1, 1), jnp.float32)
    b2_all = jnp.concatenate([hp[h]["b2"] for h in names], axis=0)
    ro = 0
    for hi, h in enumerate(names):
        w2_all = w2_all.at[ro:ro + classes[hi],
                           hi * hc:(hi + 1) * hc].set(hp[h]["w2"])
        ro += classes[hi]
    out_all = conv2d(y, w2_all, b2_all, stride=1, padding=0)

    ret = {}
    ro = 0
    for hi, h in enumerate(names):
        ret[h] = jnp.transpose(out_all[..., ro:ro + classes[hi]], (0, 3, 1, 2))
        ro += classes[hi]
    return [ret]


# ----------------------------------------------------------------------------
# Deterministic parameter construction (shapes from the torch __init__)
# ----------------------------------------------------------------------------
class _KeyGen:
    def __init__(self, key):
        self._key = key

    def __call__(self):
        self._key, k = jax.random.split(self._key)
        return k


def _conv_w(kg, cout, cin, k):
    # ResNet.__init__: normal(0, sqrt(2 / (k*k*out_channels)))
    std = math.sqrt(2.0 / (k * k * cout))
    return std * jax.random.normal(kg(), (cout, cin, k, k), jnp.float32)


def _uniform(kg, shape, bound):
    return jax.random.uniform(kg(), shape, jnp.float32, -bound, bound)


def _conv_b(kg, cout, fan_in):
    return _uniform(kg, (cout,), 1.0 / math.sqrt(fan_in))


def _bn_p(c):
    return {"g": jnp.ones((c,), jnp.float32), "b": jnp.zeros((c,), jnp.float32)}


def make_resnest_params(kg):
    sw = 64  # stem_width, deep_stem=True
    p = {
        "stem": [
            {"w": _conv_w(kg, sw, 3, 3), "bn": _bn_p(sw)},
            {"w": _conv_w(kg, sw, sw, 3), "bn": _bn_p(sw)},
            {"w": _conv_w(kg, sw * 2, sw, 3)},
        ],
        "bn1": _bn_p(sw * 2),
        "layers": [],
    }
    inplanes = sw * 2
    # (planes, blocks, stride, is_first) for ResNeSt-101 = [3, 4, 23, 3]
    cfg = [(64, 3, 1, False), (128, 4, 2, True), (256, 23, 2, True), (512, 3, 2, True)]
    for planes, nblocks, stride, is_first in cfg:
        layer = []
        for bi in range(nblocks):
            s = stride if bi == 0 else 1
            cin = inplanes if bi == 0 else planes * 4
            gw = planes                           # group_width (bw=64, card=1)
            inter = max(gw * 2 // 4, 32)          # SplAt inter_channels, radix=2
            bp = {
                "stride": s,
                "avd": bool(bi == 0 and (s > 1 or is_first)),
                "conv1_w": _conv_w(kg, gw, cin, 1),
                "bn1": _bn_p(gw),
                "splat": {
                    "conv_w": _conv_w(kg, gw * 2, gw // 2, 3),  # groups = radix*card = 2
                    "bn0": _bn_p(gw * 2),
                    "fc1_w": _conv_w(kg, inter, gw, 1),
                    "fc1_b": _conv_b(kg, inter, gw),
                    "bn1": _bn_p(inter),
                    "fc2_w": _conv_w(kg, gw * 2, inter, 1),
                    "fc2_b": _conv_b(kg, gw * 2, inter),
                },
                "conv3_w": _conv_w(kg, planes * 4, gw, 1),
                "bn3": _bn_p(planes * 4),
            }
            if bi == 0 and (s != 1 or cin != planes * 4):
                bp["down"] = {"pool_k": s,
                              "conv_w": _conv_w(kg, planes * 4, cin, 1),
                              "bn": _bn_p(planes * 4)}
            layer.append(bp)
        p["layers"].append(layer)
        inplanes = planes * 4
    return p


def _bilinear_up(k):
    f = math.ceil(k / 2)
    c = (2 * f - 1 - f % 2) / (2.0 * f)
    vals = [[(1 - abs(i / f - c)) * (1 - abs(j / f - c)) for j in range(k)]
            for i in range(k)]
    return jnp.asarray(vals, jnp.float32)


def make_deconv_params(kg):
    inplanes = 2048
    layers = []
    for planes in (256, 128, 64):
        stdv = 1.0 / math.sqrt(inplanes * 9)
        dcn = {
            "offset_w": jnp.zeros((27, inplanes, 3, 3), jnp.float32),  # zero-init
            "offset_b": jnp.zeros((27,), jnp.float32),
            "w": _uniform(kg, (planes, inplanes, 3, 3), stdv),
            "b": jnp.zeros((planes,), jnp.float32),
        }
        up_w = _uniform(kg, (planes, planes, 4, 4), 1.0 / math.sqrt(planes * 16))
        up_w = up_w.at[:, 0, :, :].set(_bilinear_up(4))  # fill_up_weights
        layers.append({"dcn": dcn, "bn1": _bn_p(planes),
                       "up_w": up_w, "bn2": _bn_p(planes)})
        inplanes = planes
    return layers


def make_head_params(kg, heads, head_conv):
    hp = {}
    for head, classes in heads.items():
        if "hm" in head:
            w1 = _uniform(kg, (head_conv, 64, 3, 3), 1.0 / math.sqrt(64 * 9))
            b1 = _conv_b(kg, head_conv, 64 * 9)
            w2 = _uniform(kg, (classes, head_conv, 1, 1), 1.0 / math.sqrt(head_conv))
            b2 = jnp.full((classes,), -2.19, jnp.float32)
        else:  # fill_fc_weights: normal(std=0.001), bias 0
            w1 = 0.001 * jax.random.normal(kg(), (head_conv, 64, 3, 3), jnp.float32)
            b1 = jnp.zeros((head_conv,), jnp.float32)
            w2 = 0.001 * jax.random.normal(kg(), (classes, head_conv, 1, 1), jnp.float32)
            b2 = jnp.zeros((classes,), jnp.float32)
        hp[head] = {"w1": w1, "b1": b1, "w2": w2, "b2": b2}
    return hp


def make_pose_resnest_params(key, heads, head_conv):
    kg = _KeyGen(key)
    return {"resnest": make_resnest_params(kg),
            "deconv": make_deconv_params(kg),
            "heads": make_head_params(kg, heads, head_conv)}


# ----------------------------------------------------------------------------
if __name__ == "__main__":
    heads = {"hm": 2, "wh": 2}
    head_conv = 64
    params = make_pose_resnest_params(jax.random.PRNGKey(1), heads, head_conv)

    x = jax.random.normal(jax.random.PRNGKey(0), (1, 3, 64, 64), jnp.float32)

    out = pose_resnest_forward(x, params)
    out = jax.block_until_ready(out)

    for h, cls in heads.items():
        assert out[0][h].shape == (1, cls, 16, 16), out[0][h].shape
        assert jnp.all(jnp.isfinite(out[0][h]))

    print("KERNEL_OK")
</pallas_src>

<mosaic_0001>
module attributes {stable_mosaic.version = 11 : i64} {
  func.func @_mm_acc_kernel(%arg0: i32, %arg1: i32, %arg2: i32, %arg3: memref<256x128xbf16, #tpu.memory_space<vmem>>, %arg4: memref<128x64xbf16, #tpu.memory_space<vmem>>, %arg5: memref<256x64xf32, #tpu.memory_space<vmem>>) attributes {dimension_semantics = [#tpu.dimension_semantics<parallel>, #tpu.dimension_semantics<parallel>, #tpu.dimension_semantics<arbitrary>], iteration_bounds = array<i64: 4, 1, 1>, scalar_prefetch = 0 : i64, scratch_operands = 0 : i64, tpu.core_type = #tpu.core_type<tc>, window_params = [{transform_indices = @transform_0, window_bounds = array<i64: 256, 128>}, {transform_indices = @transform_1, window_bounds = array<i64: 128, 64>}, {transform_indices = @transform_2, window_bounds = array<i64: 256, 64>}]} {
    %c0_i32 = arith.constant 0 : i32
    %0 = arith.cmpi eq, %arg2, %c0_i32 : i32
    %1 = arith.extui %0 : i1 to i32
    %c0_i32_0 = arith.constant 0 : i32
    %2 = arith.cmpi ne, %1, %c0_i32_0 : i32
    scf.if %2 {
      %cst_8 = arith.constant 0.000000e+00 : f32
      %9 = vector.broadcast %cst_8 : f32 to vector<256x64xf32>
      %c0_9 = arith.constant 0 : index
      %c0_10 = arith.constant 0 : index
      %10 = vector.load %arg5[%c0_9, %c0_10] : memref<256x64xf32, #tpu.memory_space<vmem>>, vector<256x64xf32>
      tpu.vector_store %arg5[%c0_9, %c0_10], %9 {strides = array<i32>} : memref<256x64xf32, #tpu.memory_space<vmem>>, vector<256x64xf32>,
    } else {
    }
    %c0 = arith.constant 0 : index
    %c0_1 = arith.constant 0 : index
    %3 = vector.load %arg5[%c0, %c0_1] : memref<256x64xf32, #tpu.memory_space<vmem>>, vector<256x64xf32>
    %c0_2 = arith.constant 0 : index
    %c0_3 = arith.constant 0 : index
    %4 = vector.load %arg3[%c0_2, %c0_3] : memref<256x128xbf16, #tpu.memory_space<vmem>>, vector<256x128xbf16>
    %c0_4 = arith.constant 0 : index
    %c0_5 = arith.constant 0 : index
    %5 = vector.load %arg4[%c0_4, %c0_5] : memref<128x64xbf16, #tpu.memory_space<vmem>>, vector<128x64xbf16>
    %cst = arith.constant dense<0.000000e+00> : vector<256x64xf32>
    %6 = tpu.matmul %4, %5, %cst {dimension_numbers = #tpu.dot_dimension_numbers<[1], [0], [0], [1], [0, 0, 1, 1], [], []>} : vector<256x128xbf16>, vector<128x64xbf16>, vector<256x64xf32> -> vector<256x64xf32>
    %7 = arith.addf %3, %6 : vector<256x64xf32>
    %c0_6 = arith.constant 0 : index
    %c0_7 = arith.constant 0 : index
    %8 = vector.load %arg5[%c0_6, %c0_7] : memref<256x64xf32, #tpu.memory_space<vmem>>, vector<256x64xf32>
    tpu.vector_store %arg5[%c0_6, %c0_7], %7 {strides = array<i32>} : memref<256x64xf32, #tpu.memory_space<vmem>>, vector<256x64xf32>,
    return
  }
  func.func @transform_0(%arg0: i32, %arg1: i32, %arg2: i32) -> (i32, i32) {
    %c0_i32 = arith.constant 0 : i32
    return %arg0, %arg2 : i32, i32
  }
  func.func @transform_1(%arg0: i32, %arg1: i32, %arg2: i32) -> (i32, i32) {
    %c0_i32 = arith.constant 0 : i32
    return %arg2, %arg1 : i32, i32
  }
  func.func @transform_2(%arg0: i32, %arg1: i32, %arg2: i32) -> (i32, i32) {
    %c0_i32 = arith.constant 0 : i32
    return %arg0, %arg1 : i32, i32
  }
}

</mosaic_0001>

<bundles_post_ra>
// kernel: conv2d.1
= control target key start
LH: loop header
LB: loop body
LE: loop exit
PB: predicated region body
PF: predicated region fallthrough
CT: control target
= control target key end

     0   :  { %7 = vsyncpa [#allocation3], 0  ;;  %s1440_s0 = inlined_call_operand.vmem [shape: bf16[1024,128], index: 0, kind: input, shape index: {}]   ;;  %s1441_s1 = inlined_call_operand.vmem [shape: bf16[128,64], index: 1, kind: input, shape index: {}]   ;;  %s1442_s2 = inlined_call_operand.hbm [shape: f32[1024,64], index: 2, kind: output, shape index: {}]  }
   0x1   :  { %9 = vsyncpa [#allocation3 + $0x1], 0  ;;  %s1117_s9 = smov 0   ;;  %s1119_s10 = smov 0  }
   0x2   :  { %s1121_s11 = smov 0   ;;  %s1123_s12 = smov 0  }
   0x3   :  { %s1125_s13 = smov 0   ;;  %s1127_s14 = smov 0  }
   0x4 LB: > { %s809_s15 = sadd.s32 4294967295, %s1096_s14   ;;  %s810_s16 = sadd.s32 4294967294, %s1096_s14   ;;  %s1096_s14 = sphi %s1127_s14, %s15_s14   ;;  %s1092_s13 = sphi %s1125_s13, %s1449_s13   ;;  %s1088_s12 = sphi %s1123_s12, %s1448_s12   ;;  %s1084_s11 = sphi %s1121_s11, %s1447_s11   ;;  %s1080_s10 = sphi %s1119_s10, %s1446_s10   ;;  %s1076_s9 = sphi %s1117_s9, %s1445_s9  }
   0x5   : > { %s34_s17 = sadd.s32 1, %s1092_s13  ;;  %s99_s18 = sadd.s32 1, %s1084_s11 }
   0x6   : > { %p36_p0 = scmp.ge.s32.totalorder %s34_s17, 4  ;;  %p109_p1 = scmp.ne.s32.totalorder %s1084_s11, %s1080_s10 }
   0x7   : > { %p110_p2 = scmp.eq.s32.totalorder %s809_s15, 3  ;;  %p115_p3 = scmp.ne.s32.totalorder %s1080_s10, %s1076_s9 }
   0x8   : > { %s1451_s17 = smov (%p36_p0, %s34_s17), 0  ;;  %p116_p5 = scmp.eq.s32.totalorder %s810_s16, 3 }
   0x9   : > { %p1157_p4 = por %p110_p2, %p109_p1  ;;  %s94_s20 = ssub.s32 %s1092_s13, %s1451_s17 }
   0xa   : > { %p814_p6 = scmp.ge.s32.totalorder %s1096_s14, 1  ;;  %p97_p7 = scmp.eq.s32.totalorder %s94_s20, 0 }
   0xb   : > { %p1164_p8 = por %p116_p5, %p115_p3  ;;  %p158_p9 = scmp.lt.s32.totalorder %s1096_s14, 5 }
   0xc   : > { %s1170_s22 = scalar_select %p97_p7, %s1084_s11, %s99_s18  }
   0xd   : > { %p159_p10 = pnand %p814_p6, %p158_p9 }
   0xe   : > { %v994_v0 = vld [vmem:[%s1441_s1] sm:$0xff] (!%p159_p10)   ;;  %s816_s25 = sshll.u32 (!%p159_p10), %s1088_s12, 5  ;;  %v995_v1 = vld [vmem:[%s1441_s1 + $0x8] sm:$0xff] (!%p159_p10)   ;;  %s188_s28 = sand.u32 (!%p159_p10), 1, %s1080_s10   ;;  %v996_v2 = vld [vmem:[%s1441_s1 + $0x10] sm:$0xff] (!%p159_p10)   ;;  %vm215_vm0 = vcmask (!%p159_p10), 523264  }
   0xf   : > { %162 = sbr.rel (%p159_p10) target bundleno = 303 (0x12f), region = 28  ;;  %p192_p11 = scmp.lt.s32.totalorder (!%p159_p10), %s816_s25, 127  ;;  %872 = vmatprep.subr.bf16.mxu0 (!%p159_p10), %v994_v0  ;;  %920 = vmatprep.subr.bf16.mxu1 (!%p159_p10), %v994_v0  ;;  %v997_v3 = vld [vmem:[%s1441_s1 + $0x18] sm:$0xff] (!%p159_p10)   ;;  %v1098_v6 = vmov (!%p159_p10), 0.0   ;;  %v998_v7 = vld [vmem:[%s1441_s1 + $0x20] sm:$0xff] (!%p159_p10)   ;;  %v999_v8 = vld [vmem:[%s1441_s1 + $0x28] sm:$0xff] (!%p159_p10)  }
  0x10   : > { %873 = vmatpush3.bf16.msra.mxu0 (!%p159_p10), %v994_v0  ;;  %928 = vmatpush3.bf16.msra.mxu1 (!%p159_p10), %v994_v0  ;;  %s815_s3 = sshll.u32 (!%p159_p10), %s188_s28, 8  ;;  %v1000_v9 = vld [vmem:[%s1441_s1 + $0x30] sm:$0xff] (!%p159_p10)   ;;  %v1001_v10 = vld [vmem:[%s1441_s1 + $0x38] sm:$0xff] (!%p159_p10)   ;;  %s847_s30 = sshll.u32 (!%p159_p10), %s1088_s12, 12 }
  0x11   : > { %874 = vmatprep.subr.bf16.mxu0 (!%p159_p10), %v995_v1  ;;  %921 = vmatprep.subr.bf16.mxu1 (!%p159_p10), %v995_v1  ;;  %s1195_s16 = scalar_lea.vmem (!%p159_p10), [#allocation2], %s815_s3  ;;  %s1376_s5 = scalar_lea.hbm (!%p159_p10), %s1442_s2, %s847_s30 }
  0x12   : > { %218 = vst.msk [vmem:[%s1195_s16 + $0x10] sm:$0xff] (!%p159_p10), %vm215_vm0, %v1098_v6  ;;  %216 = vst.msk [vmem:[%s1195_s16] sm:$0xff] (!%p159_p10), %vm215_vm0, %v1098_v6  ;;  %s713_s3 = sshll.u32 (!%p159_p10), %s1195_s16, 4  ;;  %s1394_s6 = scalar_lea.sflag (!%p159_p10), [#allocation3], %s188_s28  ;;  %s1378_s3 = int_to_ptr.vmem [resolvable:$true] %s713_s3 }
  0x13   : > { %217 = vst.msk [vmem:[%s1195_s16 + $0x8] sm:$0xff] (!%p159_p10), %vm215_vm0, %v1098_v6  ;;  %219 = vst.msk [vmem:[%s1195_s16 + $0x18] sm:$0xff] (!%p159_p10), %vm215_vm0, %v1098_v6  ;;  %s1099_s8 = smov (!%p159_p10), [#allocation2]  }
  0x14   : > { %875 = vmatpush3.bf16.msra.mxu0 (!%p159_p10), %v995_v1  ;;  %929 = vmatpush3.bf16.msra.mxu1 (!%p159_p10), %v995_v1  ;;  %220 = vst.msk [vmem:[%s1195_s16 + $0x20] sm:$0xff] (!%p159_p10), %vm215_vm0, %v1098_v6  ;;  %221 = vst.msk [vmem:[%s1195_s16 + $0x28] sm:$0xff] (!%p159_p10), %vm215_vm0, %v1098_v6  ;;  %s1022_s15 = sshll.u32 (!%p159_p10), %s1099_s8, 4  ;;  %s1023_s15 = int_to_ptr.vmem [resolvable:$false] %s1022_s15 }
  0x15   : > { %876 = vmatprep.subr.bf16.mxu0 (!%p159_p10), %v996_v2  ;;  %922 = vmatprep.subr.bf16.mxu1 (!%p159_p10), %v996_v2  ;;  %222 = vst.msk [vmem:[%s1195_s16 + $0x30] sm:$0xff] (!%p159_p10), %vm215_vm0, %v1098_v6  ;;  %223 = vst.msk [vmem:[%s1195_s16 + $0x38] sm:$0xff] (!%p159_p10), %vm215_vm0, %v1098_v6  ;;  %s1024_s18 = scalar_lea.vmem (!%p159_p10), %s1023_s15, 8192  ;;  %p1025_p1 = scmp.lt.s32.totalorder (!%p159_p10), %s1378_s3, %s1023_s15 }
  0x16   : > { %s1453_s25 = smov (!%p192_p11, %s816_s25), 127  ;;  %224 = vst.msk [vmem:[%s1195_s16 + $0x40] sm:$0xff] %vm215_vm0, %v1098_v6  ;;  %225 = vst.msk [vmem:[%s1195_s16 + $0x48] sm:$0xff] %vm215_vm0, %v1098_v6 }
  0x17   : > { %s817_s4 = sshll.u32 %s1453_s25, 2  ;;  %226 = vst.msk [vmem:[%s1195_s16 + $0x50] sm:$0xff] %vm215_vm0, %v1098_v6  ;;  %227 = vst.msk [vmem:[%s1195_s16 + $0x58] sm:$0xff] %vm215_vm0, %v1098_v6 }
  0x18   : > { %s1188_s7 = scalar_lea.vmem %s1440_s0, %s817_s4  ;;  %228 = vst.msk [vmem:[%s1195_s16 + $0x60] sm:$0xff] %vm215_vm0, %v1098_v6  ;;  %229 = vst.msk [vmem:[%s1195_s16 + $0x68] sm:$0xff] %vm215_vm0, %v1098_v6  ;;  %877 = vmatpush3.bf16.msra.mxu0 %v996_v2  ;;  %930 = vmatpush3.bf16.msra.mxu1 %v996_v2 }
  0x19   : > { %v1002_v4 = vld [vmem:[%s1188_s7] sm:$0xff]   ;;  %230 = vst.msk [vmem:[%s1195_s16 + $0x70] sm:$0xff] %vm215_vm0, %v1098_v6  ;;  %231 = vst.msk [vmem:[%s1195_s16 + $0x78] sm:$0xff] %vm215_vm0, %v1098_v6  ;;  %878 = vmatprep.subr.bf16.mxu0 %v997_v3  ;;  %923 = vmatprep.subr.bf16.mxu1 %v997_v3  ;;  %v1004_v11 = vld [vmem:[%s1188_s7 + $0x8] sm:$0xff]  }
  0x1a   : > { %v1003_v5 = vld [vmem:[%s1188_s7 + $0x40] sm:$0xff]   ;;  %232 = vst.msk [vmem:[%s1195_s16 + $0x80] sm:$0xff] %vm215_vm0, %v1098_v6  ;;  %233 = vst.msk [vmem:[%s1195_s16 + $0x88] sm:$0xff] %vm215_vm0, %v1098_v6  ;;  %888 = vmatprep.mubr.bf16.mxu0 %v1002_v4  ;;  %v1005_v12 = vld [vmem:[%s1188_s7 + $0x48] sm:$0xff]  }
  0x1b   : > { %234 = vst.msk [vmem:[%s1195_s16 + $0x90] sm:$0xff] %vm215_vm0, %v1098_v6  ;;  %235 = vst.msk [vmem:[%s1195_s16 + $0x98] sm:$0xff] %vm215_vm0, %v1098_v6  ;;  %904 = vmatprep.mubr.bf16.mxu1 %v1003_v5  ;;  %v1006_v13 = vld [vmem:[%s1188_s7 + $0x10] sm:$0xff]   ;;  %v1008_v15 = vld [vmem:[%s1188_s7 + $0x18] sm:$0xff]  }
  0x1c   : > { %236 = vst.msk [vmem:[%s1195_s16 + $0xa0] sm:$0xff] %vm215_vm0, %v1098_v6  ;;  %237 = vst.msk [vmem:[%s1195_s16 + $0xa8] sm:$0xff] %vm215_vm0, %v1098_v6  ;;  %879 = vmatpush3.bf16.msra.mxu0 %v997_v3  ;;  %931 = vmatpush3.bf16.msra.mxu1 %v997_v3  ;;  %v1007_v14 = vld [vmem:[%s1188_s7 + $0x50] sm:$0xff]   ;;  %v1009_v16 = vld [vmem:[%s1188_s7 + $0x58] sm:$0xff]  }
  0x1d   : > { %238 = vst.msk [vmem:[%s1195_s16 + $0xb0] sm:$0xff] %vm215_vm0, %v1098_v6  ;;  %239 = vst.msk [vmem:[%s1195_s16 + $0xb8] sm:$0xff] %vm215_vm0, %v1098_v6  ;;  %880 = vmatprep.subr.bf16.mxu0 %v998_v7  ;;  %924 = vmatprep.subr.bf16.mxu1 %v998_v7  ;;  %v1010_v17 = vld [vmem:[%s1188_s7 + $0x20] sm:$0xff]   ;;  %v1012_v19 = vld [vmem:[%s1188_s7 + $0x28] sm:$0xff]  }
  0x1e   : > { %240 = vst.msk [vmem:[%s1195_s16 + $0xc0] sm:$0xff] %vm215_vm0, %v1098_v6  ;;  %241 = vst.msk [vmem:[%s1195_s16 + $0xc8] sm:$0xff] %vm215_vm0, %v1098_v6  ;;  %v1011_v18 = vld [vmem:[%s1188_s7 + $0x60] sm:$0xff]   ;;  %v1013_v20 = vld [vmem:[%s1188_s7 + $0x68] sm:$0xff]  }
  0x1f   : > { %242 = vst.msk [vmem:[%s1195_s16 + $0xd0] sm:$0xff] %vm215_vm0, %v1098_v6  ;;  %243 = vst.msk [vmem:[%s1195_s16 + $0xd8] sm:$0xff] %vm215_vm0, %v1098_v6  ;;  %v1014_v21 = vld [vmem:[%s1188_s7 + $0x30] sm:$0xff]   ;;  %v1016_v23 = vld [vmem:[%s1188_s7 + $0x38] sm:$0xff]  }
  0x20   : > { %244 = vst.msk [vmem:[%s1195_s16 + $0xe0] sm:$0xff] %vm215_vm0, %v1098_v6  ;;  %245 = vst.msk [vmem:[%s1195_s16 + $0xe8] sm:$0xff] %vm215_vm0, %v1098_v6  ;;  %881 = vmatpush3.bf16.msra.mxu0 %v998_v7  ;;  %932 = vmatpush3.bf16.msra.mxu1 %v998_v7  ;;  %v1015_v22 = vld [vmem:[%s1188_s7 + $0x70] sm:$0xff]   ;;  %v1017_v24 = vld [vmem:[%s1188_s7 + $0x78] sm:$0xff]   ;;  %s1018_s7 = scalar_lea.vmem %s1378_s3, 4096 }
  0x21   : > { %246 = vst.msk [vmem:[%s1195_s16 + $0xf0] sm:$0xff] %vm215_vm0, %v1098_v6  ;;  %247 = vst.msk [vmem:[%s1195_s16 + $0xf8] sm:$0xff] %vm215_vm0, %v1098_v6  ;;  %882 = vmatprep.subr.bf16.mxu0 %v999_v8  ;;  %925 = vmatprep.subr.bf16.mxu1 %v999_v8  ;;  %v250_v25 = vld [vmem:[%s1195_s16 + $0x10] sm:$0xff]  ;;  %v248_v27 = vld [vmem:[%s1195_s16] sm:$0xff]  ;;  %p1019_p12 = scmp.ne.s32.totalorder %s1378_s3, %s1018_s7  ;;  %p1026_p2 = scmp.lt.s32.totalorder %s1024_s18, %s1018_s7 }
  0x22   : > { %v266_v26 = vld [vmem:[%s1195_s16 + $0x90] sm:$0xff]  ;;  %v264_v28 = vld [vmem:[%s1195_s16 + $0x80] sm:$0xff]  ;;  %v251_v31 = vld [vmem:[%s1195_s16 + $0x18] sm:$0xff] }
  0x23   : > { %v267_v32 = vld [vmem:[%s1195_s16 + $0x98] sm:$0xff]  ;;  %v249_v37 = vld [vmem:[%s1195_s16 + $0x8] sm:$0xff]  ;;  %v254_v49 = vld [vmem:[%s1195_s16 + $0x30] sm:$0xff]  ;;  %p1020_p13 = pnand %p1019_p12, %p1157_p4  ;;  %p1027_p3 = por %p1026_p2, %p1025_p1 }
  0x24   : > { %883 = vmatpush3.bf16.msra.mxu0 %v999_v8  ;;  %933 = vmatpush3.bf16.msra.mxu1 %v999_v8  ;;  %v265_v38 = vld [vmem:[%s1195_s16 + $0x88] sm:$0xff]  ;;  %v270_v50 = vld [vmem:[%s1195_s16 + $0xb0] sm:$0xff]  ;;  %v252_v51 = vld [vmem:[%s1195_s16 + $0x20] sm:$0xff] }
  0x25   : > { %884 = vmatprep.subr.bf16.mxu0 %v1000_v9  ;;  %926 = vmatprep.subr.bf16.mxu1 %v1000_v9  ;;  %v268_v52 = vld [vmem:[%s1195_s16 + $0xa0] sm:$0xff]  ;;  %v255_v55 = vld [vmem:[%s1195_s16 + $0x38] sm:$0xff]  ;;  %v253_v61 = vld [vmem:[%s1195_s16 + $0x28] sm:$0xff]  ;;  %p1021_p0 = pneg %p1020_p13 }
  0x26   : > { %v271_v56 = vld [vmem:[%s1195_s16 + $0xb8] sm:$0xff]  ;;  %v269_v62 = vld [vmem:[%s1195_s16 + $0xa8] sm:$0xff] }
  0x27   : > { %p1028_p5 = pnand %p1027_p3, %p1021_p0 }
  0x28   : > { %885 = vmatpush3.bf16.msra.mxu0 %v1000_v9  ;;  %934 = vmatpush3.bf16.msra.mxu1 %v1000_v9  ;;  %v258_v9 = vld [vmem:[%s1195_s16 + $0x50] sm:$0xff] }
  0x29   : > { %886 = vmatprep.subr.bf16.mxu0 %v1001_v10  ;;  %927 = vmatprep.subr.bf16.mxu1 %v1001_v10 }
  0x2c   : > { %887 = vmatpush3.bf16.msra.mxu0 %v1001_v10  ;;  %935 = vmatpush3.bf16.msra.mxu1 %v1001_v10  ;;  %v274_v10 = vld [vmem:[%s1195_s16 + $0xd0] sm:$0xff] }
  0x2f   : > { %889 = vmatmul.mubr.bf16.vlgmr.msra.gmra.mrb[0].mxu0 %v1004_v11  ;;  %905 = vmatmul.mubr.bf16.vlgmr.msra.gmra.mrb[0].mxu1 %v1005_v12  ;;  %v256_v11 = vld [vmem:[%s1195_s16 + $0x40] sm:$0xff] }
  0x30   : > { %892 = vmatprep.mubr.bf16.mxu0 %v1006_v13  ;;  %908 = vmatprep.mubr.bf16.mxu1 %v1007_v14  ;;  %v272_v12 = vld [vmem:[%s1195_s16 + $0xc0] sm:$0xff] }
  0x37   : > { %893 = vmatmul.mubr.bf16.gmra.mrb[4].mxu0 %v1008_v15  ;;  %909 = vmatmul.mubr.bf16.gmra.mrb[4].mxu1 %v1009_v16  ;;  %v259_v15 = vld [vmem:[%s1195_s16 + $0x58] sm:$0xff] }
  0x38   : > { %896 = vmatprep.mubr.bf16.mxu0 %v1010_v17  ;;  %912 = vmatprep.mubr.bf16.mxu1 %v1011_v18  ;;  %v275_v16 = vld [vmem:[%s1195_s16 + $0xd8] sm:$0xff] }
  0x3f   : > { %897 = vmatmul.mubr.bf16.gmra.mrb[8].mxu0 %v1012_v19  ;;  %913 = vmatmul.mubr.bf16.gmra.mrb[8].mxu1 %v1013_v20 }
  0x40   : > { %900 = vmatprep.mubr.bf16.mxu0 %v1014_v21  ;;  %916 = vmatprep.mubr.bf16.mxu1 %v1015_v22  ;;  %v257_v21 = vld [vmem:[%s1195_s16 + $0x48] sm:$0xff] }
  0x41   : > { %v273_v22 = vld [vmem:[%s1195_s16 + $0xc8] sm:$0xff] }
  0x47   : > { %901 = vmatmul.mubr.bf16.gmra.mrb[12].mxu0 %v1016_v23  ;;  %917 = vmatmul.mubr.bf16.gmra.mrb[12].mxu1 %v1017_v24 }
 0x102   : > { %v890_v29 = vpop.f32.mrb[0].mxu0  ;;  %v906_v30 = vpop.f32.mrb[0].mxu1 }
 0x103   : > { %v635_v33 = vadd.f32 %v890_v29, %v250_v25  ;;  %v651_v34 = vadd.f32 %v906_v30, %v266_v26  ;;  %v506_v35 = vpop.f32.mrb[1].mxu0  ;;  %v570_v36 = vpop.f32.mrb[1].mxu1 }
 0x104   : > { %v633_v39 = vadd.f32 %v506_v35, %v248_v27  ;;  %v649_v40 = vadd.f32 %v570_v36, %v264_v28  ;;  %v891_v41 = vpop.f32.mrb[2].mxu0  ;;  %v907_v42 = vpop.f32.mrb[2].mxu1  ;;  %v260_v35 = vld [vmem:[%s1195_s16 + $0x60] sm:$0xff] }
 0x105   : > { %668 = vst.msk [vmem:[%s1195_s16 + $0x10] sm:$0xff] %vm215_vm0, %v635_v33  ;;  %684 = vst.msk [vmem:[%s1195_s16 + $0x90] sm:$0xff] %vm215_vm0, %v651_v34  ;;  %v636_v43 = vadd.f32 %v891_v41, %v251_v31  ;;  %v652_v44 = vadd.f32 %v907_v42, %v267_v32  ;;  %v509_v45 = vpop.f32.mrb[3].mxu0  ;;  %v573_v46 = vpop.f32.mrb[3].mxu1  ;;  %v262_v33 = vld [vmem:[%s1195_s16 + $0x70] sm:$0xff]  ;;  %v276_v36 = vld [vmem:[%s1195_s16 + $0xe0] sm:$0xff] }
 0x106   : > { %666 = vst.msk [vmem:[%s1195_s16] sm:$0xff] %vm215_vm0, %v633_v39  ;;  %682 = vst.msk [vmem:[%s1195_s16 + $0x80] sm:$0xff] %vm215_vm0, %v649_v40  ;;  %v634_v47 = vadd.f32 %v509_v45, %v249_v37  ;;  %v650_v48 = vadd.f32 %v573_v46, %v265_v38  ;;  %v278_v34 = vld [vmem:[%s1195_s16 + $0xf0] sm:$0xff]  ;;  %v263_v39 = vld [vmem:[%s1195_s16 + $0x78] sm:$0xff] }
 0x107   : > { %669 = vst.msk [vmem:[%s1195_s16 + $0x18] sm:$0xff] %vm215_vm0, %v636_v43  ;;  %685 = vst.msk [vmem:[%s1195_s16 + $0x98] sm:$0xff] %vm215_vm0, %v652_v44  ;;  %v279_v40 = vld [vmem:[%s1195_s16 + $0xf8] sm:$0xff]  ;;  %v261_v45 = vld [vmem:[%s1195_s16 + $0x68] sm:$0xff] }
 0x108   : > { %667 = vst.msk [vmem:[%s1195_s16 + $0x8] sm:$0xff] %vm215_vm0, %v634_v47  ;;  %683 = vst.msk [vmem:[%s1195_s16 + $0x88] sm:$0xff] %vm215_vm0, %v650_v48  ;;  %v277_v46 = vld [vmem:[%s1195_s16 + $0xe8] sm:$0xff] }
 0x10a   : > { %v894_v53 = vpop.f32.mrb[4].mxu0  ;;  %v910_v54 = vpop.f32.mrb[4].mxu1 }
 0x10b   : > { %v639_v57 = vadd.f32 %v894_v53, %v254_v49  ;;  %v655_v58 = vadd.f32 %v910_v54, %v270_v50  ;;  %v522_v59 = vpop.f32.mrb[5].mxu0  ;;  %v586_v60 = vpop.f32.mrb[5].mxu1 }
 0x10c   : > { %v637_v63 = vadd.f32 %v522_v59, %v252_v51  ;;  %v653_v0 = vadd.f32 %v586_v60, %v268_v52  ;;  %v895_v1 = vpop.f32.mrb[6].mxu0  ;;  %v911_v2 = vpop.f32.mrb[6].mxu1 }
 0x10d   : > { %672 = vst.msk [vmem:[%s1195_s16 + $0x30] sm:$0xff] %vm215_vm0, %v639_v57  ;;  %688 = vst.msk [vmem:[%s1195_s16 + $0xb0] sm:$0xff] %vm215_vm0, %v655_v58  ;;  %v640_v3 = vadd.f32 %v895_v1, %v255_v55  ;;  %v656_v4 = vadd.f32 %v911_v2, %v271_v56  ;;  %v525_v5 = vpop.f32.mrb[7].mxu0  ;;  %v589_v6 = vpop.f32.mrb[7].mxu1 }
 0x10e   : > { %670 = vst.msk [vmem:[%s1195_s16 + $0x20] sm:$0xff] %vm215_vm0, %v637_v63  ;;  %686 = vst.msk [vmem:[%s1195_s16 + $0xa0] sm:$0xff] %vm215_vm0, %v653_v0  ;;  %v638_v7 = vadd.f32 %v525_v5, %v253_v61  ;;  %v654_v8 = vadd.f32 %v589_v6, %v269_v62 }
 0x10f   : > { %673 = vst.msk [vmem:[%s1195_s16 + $0x38] sm:$0xff] %vm215_vm0, %v640_v3  ;;  %689 = vst.msk [vmem:[%s1195_s16 + $0xb8] sm:$0xff] %vm215_vm0, %v656_v4 }
 0x110   : > { %671 = vst.msk [vmem:[%s1195_s16 + $0x28] sm:$0xff] %vm215_vm0, %v638_v7  ;;  %687 = vst.msk [vmem:[%s1195_s16 + $0xa8] sm:$0xff] %vm215_vm0, %v654_v8 }
 0x112   : > { %v898_v13 = vpop.f32.mrb[8].mxu0  ;;  %v914_v14 = vpop.f32.mrb[8].mxu1 }
 0x113   : > { %v643_v17 = vadd.f32 %v898_v13, %v258_v9  ;;  %v659_v18 = vadd.f32 %v914_v14, %v274_v10  ;;  %v538_v19 = vpop.f32.mrb[9].mxu0  ;;  %v602_v20 = vpop.f32.mrb[9].mxu1 }
 0x114   : > { %v641_v23 = vadd.f32 %v538_v19, %v256_v11  ;;  %v657_v24 = vadd.f32 %v602_v20, %v272_v12  ;;  %v899_v25 = vpop.f32.mrb[10].mxu0  ;;  %v915_v26 = vpop.f32.mrb[10].mxu1 }
 0x115   : > { %676 = vst.msk [vmem:[%s1195_s16 + $0x50] sm:$0xff] %vm215_vm0, %v643_v17  ;;  %692 = vst.msk [vmem:[%s1195_s16 + $0xd0] sm:$0xff] %vm215_vm0, %v659_v18  ;;  %v644_v27 = vadd.f32 %v899_v25, %v259_v15  ;;  %v660_v28 = vadd.f32 %v915_v26, %v275_v16  ;;  %v541_v29 = vpop.f32.mrb[11].mxu0  ;;  %v605_v30 = vpop.f32.mrb[11].mxu1 }
 0x116   : > { %674 = vst.msk [vmem:[%s1195_s16 + $0x40] sm:$0xff] %vm215_vm0, %v641_v23  ;;  %690 = vst.msk [vmem:[%s1195_s16 + $0xc0] sm:$0xff] %vm215_vm0, %v657_v24  ;;  %v642_v31 = vadd.f32 %v541_v29, %v257_v21  ;;  %v658_v32 = vadd.f32 %v605_v30, %v273_v22 }
 0x117   : > { %677 = vst.msk [vmem:[%s1195_s16 + $0x58] sm:$0xff] %vm215_vm0, %v644_v27  ;;  %693 = vst.msk [vmem:[%s1195_s16 + $0xd8] sm:$0xff] %vm215_vm0, %v660_v28 }
 0x118   : > { %675 = vst.msk [vmem:[%s1195_s16 + $0x48] sm:$0xff] %vm215_vm0, %v642_v31  ;;  %691 = vst.msk [vmem:[%s1195_s16 + $0xc8] sm:$0xff] %vm215_vm0, %v658_v32 }
 0x11a   : > { %v902_v37 = vpop.f32.mrb[12].mxu0  ;;  %v918_v38 = vpop.f32.mrb[12].mxu1 }
 0x11b   : > { %v647_v41 = vadd.f32 %v902_v37, %v262_v33  ;;  %v663_v42 = vadd.f32 %v918_v38, %v278_v34  ;;  %v554_v43 = vpop.f32.mrb[13].mxu0  ;;  %v618_v44 = vpop.f32.mrb[13].mxu1 }
 0x11c   : > { %v645_v47 = vadd.f32 %v554_v43, %v260_v35  ;;  %v661_v48 = vadd.f32 %v618_v44, %v276_v36  ;;  %v903_v49 = vpop.f32.mrb[14].mxu0  ;;  %v919_v50 = vpop.f32.mrb[14].mxu1 }
 0x11d   : > { %680 = vst.msk [vmem:[%s1195_s16 + $0x70] sm:$0xff] %vm215_vm0, %v647_v41  ;;  %696 = vst.msk [vmem:[%s1195_s16 + $0xf0] sm:$0xff] %vm215_vm0, %v663_v42  ;;  %v648_v51 = vadd.f32 %v903_v49, %v263_v39  ;;  %v664_v52 = vadd.f32 %v919_v50, %v279_v40  ;;  %v557_v53 = vpop.f32.mrb[15].mxu0  ;;  %v621_v54 = vpop.f32.mrb[15].mxu1 }
 0x11e   : > { %678 = vst.msk [vmem:[%s1195_s16 + $0x60] sm:$0xff] %vm215_vm0, %v645_v47  ;;  %694 = vst.msk [vmem:[%s1195_s16 + $0xe0] sm:$0xff] %vm215_vm0, %v661_v48  ;;  %v646_v55 = vadd.f32 %v557_v53, %v261_v45  ;;  %v662_v56 = vadd.f32 %v621_v54, %v277_v46 }
 0x11f   : > { %681 = vst.msk [vmem:[%s1195_s16 + $0x78] sm:$0xff] %vm215_vm0, %v648_v51  ;;  %697 = vst.msk [vmem:[%s1195_s16 + $0xf8] sm:$0xff] %vm215_vm0, %v664_v52 }
 0x120   : > { %679 = vst.msk [vmem:[%s1195_s16 + $0x68] sm:$0xff] %vm215_vm0, %v646_v55  ;;  %695 = vst.msk [vmem:[%s1195_s16 + $0xe8] sm:$0xff] %vm215_vm0, %v662_v56 }
 0x121   : > { %1031 = shalt.err (!%p1028_p5)
}
 0x122   : > { %s1032_s28 = scalar_lea.hbm %s1376_s5, 4096  ;;  %s1036_s23 = scalar_lea.hbm %s1442_s2, 16384 }
 0x123   : > { %p1033_p6 = scmp.ne.s32.totalorder %s1376_s5, %s1032_s28  ;;  %p1037_p10 = scmp.lt.u32.totalorder %s1376_s5, %s1442_s2 }
 0x124   : > { %p1038_p11 = scmp.lt.u32.totalorder %s1036_s23, %s1032_s28  ;;  %p1040_p13 = scmp.lt.u32.totalorder %s1032_s28, %s1376_s5 }
 0x125   : > { %p1034_p7 = pnand %p1033_p6, %p1157_p4 }
 0x126   : > { %p1039_p12 = por %p1038_p11, %p1037_p10 }
 0x127   : > { %p1035_p9 = pneg %p1034_p7 }
 0x128   : > { %p1041_p0 = por %p1040_p13, %p1039_p12 }
 0x12a   : > { %p1042_p1 = pnand %p1041_p0, %p1035_p9 }
 0x12c   : > { %1045 = shalt.err (!%p1042_p1)
}
 0x12d   : > { %s1100_s26 = smov 128   ;;  %s1101_s27 = smov 8  }
 0x12e   : > { %936 = dma.vmem_to_hbm [thread:$0]  (%p1157_p4), %s1378_s3, 4096, %s1376_s5, %s1394_s6, %s1100_s26, %s1100_s26, %s1101_s27  }
 0x12f PF: > { %p942_p2 = scmp.ge.s32.totalorder %s1096_s14, 2  ;;  %s728_s29 = sand.u32 1, %s1076_s9  }
 0x130   : > { %s729_s30 = scalar_lea.sflag [#allocation3], %s728_s29 }
 0x131   : > { %p939_p3 = pnand %p942_p2, %p1164_p8 }
 0x133   : > { %1071 = dma.done.wait (!%p939_p3), %s729_s30, 4096  }
 0x134   : > { %1073 = vsyncadd (!%p939_p3), %s729_s30, 4294963200  ;;  %s15_s14 = sadd.s32 1, %s1096_s14   ;;  %s1445_s9 = smov %s1080_s10 }
 0x135   : > { %p12_p5 = scmp.ge.s32.totalorder %s15_s14, 6   ;;  %s1446_s10 = smov %s1084_s11 }
 0x136   : > { %s1447_s11 = smov %s1170_s22  ;;  %s1448_s12 = smov %s1092_s13 }
 0x137   : > { %s1449_s13 = smov %s1451_s17  ;;  %14 = sbr.rel (!%p12_p5) target bundleno = 4 (0x4), region = 70 }
 0x13e   :  { %734 = vsyncpa [#allocation3], 1 }
 0x13f   :  { %736 = vsyncpa [#allocation3 + $0x1], 1 }

</bundles_post_ra>
